<compile_context>
chip_gen: v7x
topology: tpu7x:2x2x1
jax: 0.10.0
libtpu: 0.0.40
codegen_flags: <defaults>
</compile_context>

<pallas_src>
import functools
import math

import jax
import jax.numpy as jnp
from jax import lax
from jax.experimental import pallas as pl
from jax.experimental.pallas import tpu as pltpu


def _arc_margin_kernel(x_ref, wt_ref, xinv_ref, winv_ref, labels_ref, out_ref, *,
                       s, cos_m, sin_m, th, mm, easy_margin):
    j = pl.program_id(0)                      # class-tile index (outer, sharded axis)
    tb, tc = out_ref.shape

    # Raw (unnormalized) operands straight to the MXU; bf16 stays bf16, f32 accumulate.
    cosine = jnp.dot(x_ref[...], wt_ref[...],
                     preferred_element_type=jnp.float32)          # (tb, tc) f32
    # Scale by precomputed inverse norms -> true cosine (x.w / |x||w|).
    cosine = cosine * xinv_ref[...] * winv_ref[...]

    # One-hot via iota compare (no scatter).  Shift the (tb,1) labels by the
    # class-tile offset instead of offsetting the full-tile iota.
    lab_local = labels_ref[...] - j * tc                           # (tb, 1)
    col = lax.broadcasted_iota(jnp.int32, (tb, tc), 1)             # (tb, tc)
    mask = lab_local == col

    # The margin only affects the label column: gather that column's cosine with
    # a masked cross-lane reduce (XLU) and do the phi math on a (tb,1) vector.
    cos_t = jnp.sum(jnp.where(mask, cosine, 0.0), axis=1, keepdims=True)   # (tb, 1)
    sin_t = jnp.sqrt(jnp.maximum(1.0 - cos_t * cos_t, 0.0))
    phi_t = cos_t * cos_m - sin_t * sin_m
    if easy_margin:
        phi_t = jnp.where(cos_t > 0.0, phi_t, cos_t)
    else:
        phi_t = jnp.where(cos_t > th, phi_t, cos_t - mm)

    # Rows whose label is outside this class tile have an all-false mask, so the
    # (garbage) phi_t for them is never selected.
    out = jnp.where(mask, phi_t, cosine) * s
    out_ref[...] = out.astype(out_ref.dtype)


def _round_up(n, align):
    return ((n + align - 1) // align) * align


def arc_margin_product(x, weight, labels, *, s=30.0, m=0.5, easy_margin=False,
                       tile_b=512, tile_c=512):
    """ArcMarginProduct forward.

    x: (B, in_features), weight: (out_features, in_features), labels: (B,) int.
    Returns (B, out_features) scaled margin logits (same dtype as x).
    """
    B, D = x.shape
    C, D2 = weight.shape
    assert D == D2, (x.shape, weight.shape)

    # --- tile selection (pad instead of full-dimension fallback) ---------------
    b_align = 16 if x.dtype == jnp.bfloat16 else 8
    tb = min(int(tile_b), _round_up(B, b_align))
    tc = min(int(tile_c), _round_up(C, 128))
    Bp = _round_up(B, tb)
    Cp = _round_up(C, tc)

    # --- pad operands (padded rows/cols are zero; labels never match pad cols) -
    xp = x if Bp == B else jnp.pad(x, ((0, Bp - B), (0, 0)))
    wp = weight if Cp == C else jnp.pad(weight, ((0, Cp - C), (0, 0)))
    labels2d = labels.astype(jnp.int32).reshape(B, 1)
    if Bp != B:
        labels2d = jnp.pad(labels2d, ((0, Bp - B), (0, 0)), constant_values=-1)

    # --- hoisted normalization: inverse row norms, computed once ---------------
    xf = xp.astype(jnp.float32)
    wf = wp.astype(jnp.float32)
    x_inv = 1.0 / jnp.maximum(
        jnp.sqrt(jnp.sum(xf * xf, axis=1, keepdims=True)), 1e-12)      # (Bp, 1)
    w_inv = (1.0 / jnp.maximum(
        jnp.sqrt(jnp.sum(wf * wf, axis=1, keepdims=True)), 1e-12)).T   # (1, Cp)
    wt = wp.T                                                           # (D, Cp)

    grid = (Cp // tc, Bp // tb)   # class axis outermost (sharded); W streamed once

    kernel = functools.partial(
        _arc_margin_kernel,
        s=float(s),
        cos_m=math.cos(m),
        sin_m=math.sin(m),
        th=math.cos(math.pi - m),
        mm=math.sin(math.pi - m) * m,
        easy_margin=easy_margin,
    )

    in_bytes = jnp.dtype(x.dtype).itemsize
    w_bytes = jnp.dtype(weight.dtype).itemsize
    out_bytes = in_bytes
    # double-buffered tiles + f32 in-kernel temporaries, with headroom
    vmem_est = 2 * (tb * D * in_bytes + D * tc * w_bytes + tb * tc * out_bytes) \
               + 6 * tb * tc * 4
    vmem_limit = int(min(64 * 1024 * 1024, max(32 * 1024 * 1024, 2 * vmem_est)))

    cost = pl.CostEstimate(
        flops=2 * Bp * Cp * D,
        transcendentals=0,
        bytes_accessed=Bp * D * in_bytes + Cp * D * w_bytes + Bp * Cp * out_bytes,
    )

    out = pl.pallas_call(
        kernel,
        out_shape=jax.ShapeDtypeStruct((Bp, Cp), x.dtype),
        grid_spec=pltpu.PrefetchScalarGridSpec(
            num_scalar_prefetch=0,
            grid=grid,
            in_specs=[
                pl.BlockSpec((tb, D), lambda j, i: (i, 0)),    # x batch tile (raw)
                pl.BlockSpec((D, tc), lambda j, i: (0, j)),    # W^T class tile (raw)
                pl.BlockSpec((tb, 1), lambda j, i: (i, 0)),    # 1/|x| column
                pl.BlockSpec((1, tc), lambda j, i: (0, j)),    # 1/|w| row
                pl.BlockSpec((tb, 1), lambda j, i: (i, 0)),    # labels column
            ],
            out_specs=pl.BlockSpec((tb, tc), lambda j, i: (i, j)),
        ),
        compiler_params=pltpu.CompilerParams(
            dimension_semantics=("parallel", "parallel"),
            vmem_limit_bytes=vmem_limit,
        ),
        cost_estimate=cost,
    )(xp, wt, x_inv, w_inv, labels2d)

    if Bp != B or Cp != C:
        out = out[:B, :C]
    return out


def arc_margin_reference(x, weight, labels, *, s=30.0, m=0.5, easy_margin=False):
    """Pure-JAX reference mirroring the PyTorch forward (f32, highest precision)."""
    x = x.astype(jnp.float32)
    w = weight.astype(jnp.float32)
    xn = x / jnp.maximum(jnp.linalg.norm(x, axis=1, keepdims=True), 1e-12)
    wn = w / jnp.maximum(jnp.linalg.norm(w, axis=1, keepdims=True), 1e-12)
    cosine = jnp.dot(xn, wn.T, precision=lax.Precision.HIGHEST)
    sine = jnp.sqrt(jnp.clip(1.0 - cosine ** 2, 0.0, 1.0))
    cos_m, sin_m = math.cos(m), math.sin(m)
    th = math.cos(math.pi - m)
    mm = math.sin(math.pi - m) * m
    phi = cosine * cos_m - sine * sin_m
    if easy_margin:
        phi = jnp.where(cosine > 0.0, phi, cosine)
    else:
        phi = jnp.where(cosine > th, phi, cosine - mm)
    one_hot = jax.nn.one_hot(labels, w.shape[0], dtype=jnp.float32)
    return (one_hot * phi + (1.0 - one_hot) * cosine) * s


if __name__ == "__main__":
    # Module construction: ArcMarginProduct(in_features, out_features, s, m)
    in_features = 32
    out_features = 16
    batch = 8
    s_, m_ = 30.0, 0.5

    key = jax.random.PRNGKey(0)
    k_w, k_x, k_l = jax.random.split(key, 3)

    # xavier_uniform_ init for (out_features, in_features) weight
    limit = math.sqrt(6.0 / (in_features + out_features))
    weight = jax.random.uniform(k_w, (out_features, in_features),
                                minval=-limit, maxval=limit, dtype=jnp.float32)
    x = jax.random.normal(k_x, (batch, in_features), dtype=jnp.float32)
    labels = jax.random.randint(k_l, (batch,), 0, out_features, dtype=jnp.int32)

    out = jax.block_until_ready(arc_margin_product(x, weight, labels, s=s_, m=m_))
    ref = jax.block_until_ready(arc_margin_reference(x, weight, labels, s=s_, m=m_))

    assert out.shape == (batch, out_features), out.shape
    assert jnp.allclose(out, ref, rtol=1e-4, atol=1e-4), (out, ref)
    print("KERNEL_OK")
</pallas_src>

<mosaic_0001>
module attributes {stable_mosaic.version = 11 : i64} {
  func.func @_arc_margin_kernel(%arg0: i32, %arg1: i32, %arg2: memref<8x32xf32, #tpu.memory_space<vmem>>, %arg3: memref<32x128xf32, #tpu.memory_space<vmem>>, %arg4: memref<8x1xf32, #tpu.memory_space<vmem>>, %arg5: memref<1x128xf32, #tpu.memory_space<vmem>>, %arg6: memref<8x1xi32, #tpu.memory_space<vmem>>, %arg7: memref<8x128xf32, #tpu.memory_space<vmem>>) attributes {dimension_semantics = [#tpu.dimension_semantics<parallel>, #tpu.dimension_semantics<parallel>], iteration_bounds = array<i64: 1, 1>, scalar_prefetch = 0 : i64, scratch_operands = 0 : i64, tpu.core_type = #tpu.core_type<tc>, window_params = [{transform_indices = @transform_0, window_bounds = array<i64: 8, 32>}, {transform_indices = @transform_1, window_bounds = array<i64: 32, 128>}, {transform_indices = @transform_2, window_bounds = array<i64: 8, 1>}, {transform_indices = @transform_3, window_bounds = array<i64: 1, 128>}, {transform_indices = @transform_4, window_bounds = array<i64: 8, 1>}, {transform_indices = @transform_5, window_bounds = array<i64: 8, 128>}]} {
    %c0 = arith.constant 0 : index
    %c0_0 = arith.constant 0 : index
    %0 = vector.load %arg2[%c0, %c0_0] : memref<8x32xf32, #tpu.memory_space<vmem>>, vector<8x32xf32>
    %c0_1 = arith.constant 0 : index
    %c0_2 = arith.constant 0 : index
    %1 = vector.load %arg3[%c0_1, %c0_2] : memref<32x128xf32, #tpu.memory_space<vmem>>, vector<32x128xf32>
    %cst = arith.constant dense<0.000000e+00> : vector<8x128xf32>
    %2 = tpu.matmul %0, %1, %cst {dimension_numbers = #tpu.dot_dimension_numbers<[1], [0], [0], [1], [0, 0, 1, 1], [], []>} : vector<8x32xf32>, vector<32x128xf32>, vector<8x128xf32> -> vector<8x128xf32>
    %c0_3 = arith.constant 0 : index
    %c0_4 = arith.constant 0 : index
    %3 = vector.load %arg4[%c0_3, %c0_4] : memref<8x1xf32, #tpu.memory_space<vmem>>, vector<8x1xf32>
    %4 = vector.broadcast %3 : vector<8x1xf32> to vector<8x128xf32>
    %5 = arith.mulf %2, %4 : vector<8x128xf32>
    %c0_5 = arith.constant 0 : index
    %c0_6 = arith.constant 0 : index
    %6 = vector.load %arg5[%c0_5, %c0_6] : memref<1x128xf32, #tpu.memory_space<vmem>>, vector<1x128xf32>
    %7 = vector.broadcast %6 : vector<1x128xf32> to vector<8x128xf32>
    %8 = arith.mulf %5, %7 : vector<8x128xf32>
    %c0_7 = arith.constant 0 : index
    %c0_8 = arith.constant 0 : index
    %9 = vector.load %arg6[%c0_7, %c0_8] : memref<8x1xi32, #tpu.memory_space<vmem>>, vector<8x1xi32>
    %c128_i32 = arith.constant 128 : i32
    %10 = arith.muli %arg0, %c128_i32 : i32
    %11 = vector.broadcast %10 : i32 to vector<8x1xi32>
    %12 = arith.subi %9, %11 : vector<8x1xi32>
    %13 = tpu.iota {dimensions = array<i32: 1>} : vector<8x128xi32>
    %14 = vector.broadcast %12 : vector<8x1xi32> to vector<8x128xi32>
    %15 = arith.cmpi eq, %14, %13 : vector<8x128xi32>
    %cst_9 = arith.constant 0.000000e+00 : f32
    %16 = vector.broadcast %cst_9 : f32 to vector<8x128xf32>
    %17 = arith.select %15, %8, %16 : vector<8x128xi1>, vector<8x128xf32>
    %cst_10 = arith.constant dense<0.000000e+00> : vector<8xf32>
    %18 = vector.multi_reduction <add>, %17, %cst_10 [1] : vector<8x128xf32> to vector<8xf32>
    %19 = vector.shape_cast %18 : vector<8xf32> to vector<8x1xf32>
    %20 = arith.mulf %19, %19 : vector<8x1xf32>
    %cst_11 = arith.constant 1.000000e+00 : f32
    %21 = vector.broadcast %cst_11 : f32 to vector<8x1xf32>
    %22 = arith.subf %21, %20 : vector<8x1xf32>
    %cst_12 = arith.constant 0.000000e+00 : f32
    %23 = vector.broadcast %cst_12 : f32 to vector<8x1xf32>
    %24 = arith.maximumf %22, %23 : vector<8x1xf32>
    %25 = math.sqrt %24 : vector<8x1xf32>
    %cst_13 = arith.constant 0.87758255 : f32
    %26 = vector.broadcast %cst_13 : f32 to vector<8x1xf32>
    %27 = arith.mulf %19, %26 : vector<8x1xf32>
    %cst_14 = arith.constant 0.47942555 : f32
    %28 = vector.broadcast %cst_14 : f32 to vector<8x1xf32>
    %29 = arith.mulf %25, %28 : vector<8x1xf32>
    %30 = arith.subf %27, %29 : vector<8x1xf32>
    %cst_15 = arith.constant -0.87758255 : f32
    %31 = vector.broadcast %cst_15 : f32 to vector<8x1xf32>
    %32 = arith.cmpf ogt, %19, %31 : vector<8x1xf32>
    %cst_16 = arith.constant 0.239712775 : f32
    %33 = vector.broadcast %cst_16 : f32 to vector<8x1xf32>
    %34 = arith.subf %19, %33 : vector<8x1xf32>
    %35 = arith.select %32, %30, %34 : vector<8x1xi1>, vector<8x1xf32>
    %36 = vector.shape_cast %35 : vector<8x1xf32> to vector<8x1xf32>
    %37 = vector.broadcast %36 : vector<8x1xf32> to vector<8x128xf32>
    %38 = arith.select %15, %37, %8 : vector<8x128xi1>, vector<8x128xf32>
    %cst_17 = arith.constant 3.000000e+01 : f32
    %39 = vector.broadcast %cst_17 : f32 to vector<8x128xf32>
    %40 = arith.mulf %38, %39 : vector<8x128xf32>
    %c0_18 = arith.constant 0 : index
    %c0_19 = arith.constant 0 : index
    %41 = vector.load %arg7[%c0_18, %c0_19] : memref<8x128xf32, #tpu.memory_space<vmem>>, vector<8x128xf32>
    tpu.vector_store %arg7[%c0_18, %c0_19], %40 {strides = array<i32>} : memref<8x128xf32, #tpu.memory_space<vmem>>, vector<8x128xf32>,
    return
  }
  func.func @transform_0(%arg0: i32, %arg1: i32) -> (i32, i32) {
    %c0_i32 = arith.constant 0 : i32
    %c0_i32_0 = arith.constant 0 : i32
    return %arg1, %c0_i32 : i32, i32
  }
  func.func @transform_1(%arg0: i32, %arg1: i32) -> (i32, i32) {
    %c0_i32 = arith.constant 0 : i32
    %c0_i32_0 = arith.constant 0 : i32
    return %c0_i32, %arg0 : i32, i32
  }
  func.func @transform_2(%arg0: i32, %arg1: i32) -> (i32, i32) {
    %c0_i32 = arith.constant 0 : i32
    %c0_i32_0 = arith.constant 0 : i32
    return %arg1, %c0_i32 : i32, i32
  }
  func.func @transform_3(%arg0: i32, %arg1: i32) -> (i32, i32) {
    %c0_i32 = arith.constant 0 : i32
    %c0_i32_0 = arith.constant 0 : i32
    return %c0_i32, %arg0 : i32, i32
  }
  func.func @transform_4(%arg0: i32, %arg1: i32) -> (i32, i32) {
    %c0_i32 = arith.constant 0 : i32
    %c0_i32_0 = arith.constant 0 : i32
    return %arg1, %c0_i32 : i32, i32
  }
  func.func @transform_5(%arg0: i32, %arg1: i32) -> (i32, i32) {
    %c0_i32 = arith.constant 0 : i32
    return %arg1, %arg0 : i32, i32
  }
}

</mosaic_0001>

<bundles_post_ra>
// kernel: tpu_custom_call.1
= control target key start
LH: loop header
LB: loop body
LE: loop exit
PB: predicated region body
PF: predicated region fallthrough
CT: control target
= control target key end

     0   :  { %10 = vsyncpa [#allocation3], 0  ;;  %s336_s0 = inlined_call_operand.vmem [shape: f32[8,32], index: 0, kind: input, shape index: {}]   ;;  %s337_s1 = inlined_call_operand.hbm [shape: f32[32,128], index: 1, kind: input, shape index: {}]   ;;  %s338_s2 = inlined_call_operand.vmem [shape: f32[8,1], index: 2, kind: input, shape index: {}]   ;;  %s339_s3 = inlined_call_operand.vmem [shape: f32[1,128], index: 3, kind: input, shape index: {}]   ;;  %s340_s4 = inlined_call_operand.vmem [shape: s32[8,1], index: 4, kind: input, shape index: {}]   ;;  %s341_s5 = inlined_call_operand.hbm [shape: f32[8,128], index: 5, kind: output, shape index: {}]  }
   0x1   :  { %11 = vsyncpa [#allocation4], 0  ;;  %s260_s18 = smov [#allocation2]   ;;  %s212_s22 = scalar_lea.hbm %s337_s1, 512 }
   0x2   :  { %s19_s19 = sshll.u32 %s260_s18, 4  ;;  %p213_p0 = scmp.ne.s32.totalorder %s337_s1, %s212_s22  ;;  %s20_s19 = int_to_ptr.vmem [resolvable:$true] %s19_s19 }
   0x3   :  { %p216_p1 = scmp.lt.u32.totalorder %s212_s22, %s337_s1 }
   0x5   :  { %p218_p2 = pnand %p216_p1, %p213_p0 }
   0x7   :  { %221 = shalt.err (!%p218_p2)
}
   0x8   :  { %s222_s27 = scalar_lea.vmem %s20_s19, 512  ;;  %p227_p4 = scmp.lt.s32.totalorder %s20_s19, %s20_s19 }
   0x9   :  { %p223_p3 = scmp.ne.s32.totalorder %s20_s19, %s222_s27  ;;  %p228_p5 = scmp.lt.s32.totalorder %s222_s27, %s222_s27 }
   0xb   :  { %p229_p6 = por %p228_p5, %p227_p4 }
   0xd   :  { %p230_p7 = pnand %p229_p6, %p223_p3 }
   0xf   :  { %233 = shalt.err (!%p230_p7)
}
  0x10   :  { %s261_s28 = smov 128   ;;  %s262_s29 = smov 8  }
  0x11   :  { %25 = dma.hbm_to_vmem [thread:$0]  %s337_s1, 512, %s20_s19, [#allocation3], %s261_s28, %s261_s28, %s262_s29  }
  0x12   :  { %256 = dma.done.wait [#allocation3], 512  }
  0x13   :  { %257 = vsyncadd [#allocation3], 4294966784  ;;  %v263_v0 = vmov 0.0|0.0   ;;  %vm264_vm0 = vmmov 0   ;;  %v265_v1 = vmov 0.0   ;;  %v266_v2 = vmov 0  }
  0x14   :  { %195 = vmatprep.subr.bf16.mxu0 %v263_v0  ;;  %192 = vmatprep.mubr.msk.f32.mxu0 %vm264_vm0, %v265_v1  ;;  %v36_v3 = vld [vmem:[#allocation2] sm:$0xff]  ;;  %v37_v4 = vld [vmem:[#allocation2 + $0x8] sm:$0xff]  ;;  %v38_v5 = vld [vmem:[#allocation2 + $0x10] sm:$0xff]  ;;  %vm40_vm1 = vcmask 261120   ;;  %v133_v13 = vlaneseq }
  0x15   :  { %209 = vset.pattern.permute.xlu0 %v266_v2  ;;  %v196_v6 = vpack.c.bf16 %v37_v4, %v36_v3  ;;  %v39_v7 = vld [vmem:[#allocation2 + $0x18] sm:$0xff]  ;;  %v114_v8 = vld [vmem:[%s338_s2] sm:$0xff] }
  0x16   :  { %117 = vperm.xlu0 %209, %v114_v8   ;;  %v199_v9 = vpack.c.bf16 %v39_v7, %v38_v5  ;;  %v129_v10 = vld [vmem:[%s340_s4] sm:$0xff]  ;;  %v134_v14 = vand.u32 127, %v133_v13 }
  0x17   :  { %197 = vmatpush3.bf16.msra.mxu0 %v196_v6  ;;  %v35_v11 = vld [vmem:[%s336_s0] sm:$0xff]  ;;  %s267_s0 = smov [#allocation5]  }
  0x18   :  { %198 = vmatprep.subr.bf16.mxu0 %v263_v0  ;;  %v177_v16 = vld [vmem:[%s339_s3] ss:$0 sm:$0xff]  ;;  %s167_s3 = sshll.u32 %s267_s0, 4  ;;  %s168_s3 = int_to_ptr.vmem [resolvable:$true] %s167_s3 }
  0x19   :  { %s234_s4 = scalar_lea.vmem %s168_s3, 128  ;;  %p239_p9 = scmp.lt.s32.totalorder %s168_s3, %s168_s3 }
  0x1a   :  { %136 = vperm.xlu0 %209, %v129_v10   ;;  %p235_p8 = scmp.ne.s32.totalorder %s168_s3, %s234_s4  ;;  %p240_p10 = scmp.lt.s32.totalorder %s234_s4, %s234_s4 }
  0x1b   :  { %200 = vmatpush3.bf16.msra.mxu0 %v199_v9 }
  0x1c   :  { %p241_p11 = por %p240_p10, %p239_p9 }
  0x1e   :  { %193 = vmatmul.mubr.msk.f32.vlgmr.msra.gmra.mrb[0].mxu0 %vm40_vm1, %v35_v11  ;;  %p242_p12 = pnand %p241_p11, %p235_p8 }
  0x95   :  { %v118_v12 = vpop.permute.xlu0 %117 }
  0x99   :  { %v137_v17 = vpop.permute.xlu0 %136 }
  0x9a   :  { %vm138_vm2 = vcmp.eq.s32.totalorder %v137_v17, %v134_v14 }
  0xf1   :  { %v110_v15 = vpop.f32.mrb[0].mxu0 }
  0xf2   :  { %v120_v18 = vmul.f32 %v118_v12, %v110_v15  ;;  %v194_v19 = vpop.f32.mrb[1].mxu0 }
  0xf4   :  { %v128_v20 = vmul.f32 %v177_v16, %v120_v18 }
  0xf6   :  { %v139_v21 = vsel %vm138_vm2, %v128_v20, 0.0 }
  0xf7   :  { %140 = vadd.xlane.f32.xlu1 %v139_v21 }
 0x184   :  { %v141_v22 = vpop.xlane.xlu1 %140 }
 0x185   :  { %v142_v23 = vmul.f32 %v141_v22, %v141_v22  ;;  %v152_v31 = vmul.f32 0.87758255, %v141_v22  ;;  %v178_v34 = vadd.f32 -0.23971277, %v141_v22  ;;  %vm155_vm5 = vcmp.gt.f32.partialorder %v141_v22, -0.87758255 }
 0x187   :  { %v143_v24 = vsub.f32 1.0, %v142_v23 }
 0x189   :  { %v144_v25 = vmax.f32 %v143_v24, 0.0 }
 0x18b   :  { %210 = vrsqrt.f32 %v144_v25  ;;  %vm147_vm3 = vcmp.eq.f32.partialorder %v144_v25, inf  ;;  %v150_v28 = vand.u32 2147483648, %v144_v25  ;;  %vm149_vm4 = vcmp.eq.f32.partialorder %v144_v25, 0.0 }
 0x195   :  { %v211_v26 = vpop.eup %210 }
 0x196   :  { %v146_v27 = vmul.f32 %v211_v26, %v144_v25 }
 0x198   :  { %v148_v29 = vsel %vm147_vm3, %v144_v25, %v146_v27 }
 0x199   :  { %v151_v30 = vsel %vm149_vm4, %v150_v28, %v148_v29 }
 0x19a   :  { %v153_v32 = vmul.f32 0.47942555, %v151_v30 }
 0x19c   :  { %v154_v33 = vsub.f32 %v152_v31, %v153_v32 }
 0x19e   :  { %v157_v35 = vsel %vm155_vm5, %v154_v33, %v178_v34 }
 0x19f   :  { %v158_v36 = vsel %vm138_vm2, %v157_v35, %v128_v20 }
 0x1a0   :  { %v159_v37 = vmul.f32 30.0, %v158_v36 }
 0x1a2   :  { %160 = vst [vmem:[#allocation5] sm:$0xff] %v159_v37 }
 0x1a3   :  { %245 = shalt.err (!%p242_p12)
}
 0x1a4   :  { %s246_s15 = scalar_lea.hbm %s341_s5, 128 }
 0x1a5   :  { %p247_p13 = scmp.ne.s32.totalorder %s341_s5, %s246_s15  ;;  %p250_p0 = scmp.lt.u32.totalorder %s246_s15, %s341_s5 }
 0x1a7   :  { %p252_p1 = pnand %p250_p0, %p247_p13 }
 0x1a9   :  { %255 = shalt.err (!%p252_p1)
}
 0x1aa   :  { %170 = dma.vmem_to_hbm [thread:$0]  %s168_s3, 128, %s341_s5, [#allocation4]  }
 0x1ab   :  { %258 = dma.done.wait [#allocation4], 128  }
 0x1ac   :  { %259 = vsyncadd [#allocation4], 4294967168 }
 0x1ad   :  { %174 = vsyncpa [#allocation3], 1 }
 0x1ae   :  { %175 = vsyncpa [#allocation4], 1 }

</bundles_post_ra>
